<compile_context>
chip_gen: v6e
topology: v6e:2x2x1
jax: 0.10.0
libtpu: 0.0.40
codegen_flags: <defaults>
</compile_context>

<pallas_src>
import jax
import jax.numpy as jnp
from jax.experimental import pallas as pl
from jax.experimental.pallas import tpu as pltpu


# ----------------------------------------------------------------------------
# helpers
# ----------------------------------------------------------------------------
def _round_up(x, m):
    return (x + m - 1) // m * m


# ----------------------------------------------------------------------------
# Pallas kernels
# ----------------------------------------------------------------------------
def _matmul_stats_kernel(a_ref, b_ref, y_ref, sum_ref, ssq_ref):
    """y = a @ b (full-K, full-N blocks) + per-tile column sum / sum-of-squares."""
    y = jnp.dot(a_ref[...], b_ref[...], preferred_element_type=jnp.float32)
    y_ref[...] = y
    s = jnp.sum(y, axis=0, keepdims=True)            # (1, N)
    q = jnp.sum(y * y, axis=0, keepdims=True)        # (1, N)
    # stats blocks are (1, 8, N) to keep the (8, 128) layout rule; broadcast on sublanes.
    sum_ref[...] = jnp.broadcast_to(s[None], sum_ref.shape)
    ssq_ref[...] = jnp.broadcast_to(q[None], ssq_ref.shape)


def _affine_relu_kernel(y_ref, s_ref, b_ref, o_ref):
    """Fused per-column affine (BatchNorm scale/shift) + ReLU, lane-dense output."""
    o_ref[...] = jnp.maximum(y_ref[...] * s_ref[...] + b_ref[...], 0.0)


# ----------------------------------------------------------------------------
# Pallas wrappers
# ----------------------------------------------------------------------------
def _matmul_stats(a, b, tm):
    """(Mp,K) @ (K,N) -> y:(Mp,N), per-tile sums:(mt,8,N), per-tile sumsq:(mt,8,N)."""
    Mp, K = a.shape
    _, ncol = b.shape
    mt = Mp // tm
    return pl.pallas_call(
        _matmul_stats_kernel,
        out_shape=(jax.ShapeDtypeStruct((Mp, ncol), jnp.float32),
                   jax.ShapeDtypeStruct((mt, 8, ncol), jnp.float32),
                   jax.ShapeDtypeStruct((mt, 8, ncol), jnp.float32)),
        grid_spec=pltpu.PrefetchScalarGridSpec(
            num_scalar_prefetch=0,
            grid=(mt,),
            in_specs=[pl.BlockSpec((tm, K), lambda i: (i, 0)),
                      pl.BlockSpec((K, ncol), lambda i: (0, 0))],
            out_specs=[pl.BlockSpec((tm, ncol), lambda i: (i, 0)),
                       pl.BlockSpec((1, 8, ncol), lambda i: (i, 0, 0)),
                       pl.BlockSpec((1, 8, ncol), lambda i: (i, 0, 0))]),
        compiler_params=pltpu.CompilerParams(
            dimension_semantics=("parallel",)),
    )(a, b)


def _affine_relu(y, scale_cols, shift_cols, tm):
    Mp, ncol = y.shape
    mt = Mp // tm
    return pl.pallas_call(
        _affine_relu_kernel,
        out_shape=jax.ShapeDtypeStruct((Mp, ncol), jnp.float32),
        grid_spec=pltpu.PrefetchScalarGridSpec(
            num_scalar_prefetch=0,
            grid=(mt,),
            in_specs=[pl.BlockSpec((tm, ncol), lambda i: (i, 0)),
                      pl.BlockSpec((1, ncol), lambda i: (0, 0)),
                      pl.BlockSpec((1, ncol), lambda i: (0, 0))],
            out_specs=pl.BlockSpec((tm, ncol), lambda i: (i, 0))),
        compiler_params=pltpu.CompilerParams(
            dimension_semantics=("parallel",)),
    )(y, scale_cols, shift_cols)


# ----------------------------------------------------------------------------
# EMD_Decoder_Block
# ----------------------------------------------------------------------------
class EMDDecoderBlockPallas:
    """ConvTranspose2d(Cin, Cout, k, s, p, output_padding=add, bias=False)
       [+ BatchNorm2d(Cout) + ReLU] — sub-pixel Pallas lowering."""

    def __init__(self, weight, kernel_size, stride, padding, add,
                 inner_layer=True, eps=1e-5):
        self.k = int(kernel_size)
        self.s = int(stride)
        self.p = int(padding)
        self.op = int(add)
        self.inner = bool(inner_layer)
        self.eps = float(eps)
        self.Cin = int(weight.shape[0])
        self.Cout = int(weight.shape[1])

        # Static sub-pixel tap plan: for output residue t (oh % s == t), the taps are
        # kh with (t + p - kh) % s == 0, contributing input row ih = m + off,
        # off = (t + p - kh) // s, where oh = s*m + t.
        taps = []
        for t in range(self.s):
            tl = [(kh, (t + self.p - kh) // self.s)
                  for kh in range(self.k) if (t + self.p - kh) % self.s == 0]
            taps.append(tl)
        offs = [o for tl in taps for _, o in tl]
        self.off_min = min(offs)
        self.D = max(offs) - self.off_min + 1          # shared window size (2 for k=3,s=2)
        self.taps = taps

        # Hoisted, precomputed combined matmul weight (D*D*Cin, s*s*Cout).
        self.wmat = self._build_wmat(jnp.asarray(weight, jnp.float32))

        self._fwd = jax.jit(self._forward)

    # -- weight matrix ---------------------------------------------------------
    def _build_wmat(self, w):
        D, s, Cin, Cout = self.D, self.s, self.Cin, self.Cout
        wmat = jnp.zeros((D * D * Cin, s * s * Cout), jnp.float32)
        for th in range(s):
            for tw in range(s):
                g = th * s + tw
                for kh, oh in self.taps[th]:
                    dh = oh - self.off_min
                    for kw, ow in self.taps[tw]:
                        dw = ow - self.off_min
                        r0 = (dh * D + dw) * Cin
                        wmat = wmat.at[r0:r0 + Cin,
                                       g * Cout:(g + 1) * Cout].set(w[:, :, kh, kw])
        return wmat

    # -- static per-axis spatial plan -----------------------------------------
    def _axis_plan(self, n):
        out = (n - 1) * self.s - 2 * self.p + self.k + self.op
        m = -(-out // self.s)                          # ceil(out / s)
        lo = self.off_min
        need = m + self.D - 1                          # input rows spanned (from index lo)
        crop_lo = max(0, lo)
        take_hi = min(n, lo + need)
        pad_lo = max(0, -lo)
        pad_hi = max(0, lo + need - n)
        return out, m, crop_lo, take_hi, pad_lo, pad_hi

    # -- pixel shuffle ---------------------------------------------------------
    def _shuffle(self, y_flat, B, mh, mw, out_h, out_w):
        s, Cout = self.s, self.Cout
        y = y_flat.reshape(B, mh, mw, s, s, Cout)
        y = jnp.transpose(y, (0, 1, 3, 2, 4, 5)).reshape(B, s * mh, s * mw, Cout)
        return y[:, :out_h, :out_w, :]

    # -- forward ---------------------------------------------------------------
    def _forward(self, x_nchw):
        B, Cin, H, W = x_nchw.shape
        s, D, Cout = self.s, self.D, self.Cout
        out_h, mh, ch, th_, ph_lo, ph_hi = self._axis_plan(H)
        out_w, mw, cw, tw_, pw_lo, pw_hi = self._axis_plan(W)

        x = jnp.transpose(x_nchw, (0, 2, 3, 1)).astype(jnp.float32)        # NHWC
        x = x[:, ch:th_, cw:tw_, :]
        x = jnp.pad(x, ((0, 0), (ph_lo, ph_hi), (pw_lo, pw_hi), (0, 0)))

        # small DxD im2col (glue): D = ceil(k/s) shifted slices, no zero-insertion.
        cols = [x[:, i:i + mh, j:j + mw, :] for i in range(D) for j in range(D)]
        patches = jnp.concatenate(cols, axis=-1).reshape(B * mh * mw, D * D * Cin)

        M, K = patches.shape
        ncol = s * s * Cout
        tm = min(256, _round_up(M, 8))
        Mp = _round_up(M, tm)
        if Mp != M:
            patches = jnp.pad(patches, ((0, Mp - M), (0, 0)))   # zero rows: inert in stats

        y, psum, pssq = _matmul_stats(patches, self.wmat, tm)

        if self.inner:
            no_crop = (s * mh == out_h) and (s * mw == out_w)
            if no_crop:
                count = float(B * out_h * out_w)
                sum_c = psum[:, 0, :].sum(axis=0).reshape(s * s, Cout).sum(axis=0)
                ssq_c = pssq[:, 0, :].sum(axis=0).reshape(s * s, Cout).sum(axis=0)
                mean = sum_c / count
                var = ssq_c / count - mean * mean                 # biased variance
            else:
                # TODO(synk): cropped-output configs fall back to an exact jnp stat
                # reduction over the valid (cropped) conv output.
                y_sp = self._shuffle(y[:M], B, mh, mw, out_h, out_w)
                mean = jnp.mean(y_sp, axis=(0, 1, 2))
                var = jnp.mean(jnp.square(y_sp - mean), axis=(0, 1, 2))
            scale = 1.0 / jnp.sqrt(var + self.eps)                # gamma = 1
            shift = -mean * scale                                 # beta  = 0
            scale_cols = jnp.tile(scale, s * s)[None, :]          # column layout (g, co)
            shift_cols = jnp.tile(shift, s * s)[None, :]
            y = _affine_relu(y, scale_cols, shift_cols, tm)

        y = self._shuffle(y[:M], B, mh, mw, out_h, out_w)
        return jnp.transpose(y, (0, 3, 1, 2))                     # back to NCHW

    def __call__(self, x):
        return self._fwd(x)


# ----------------------------------------------------------------------------
# pure-JAX reference (dilate-free scatter formulation) for correctness check
# ----------------------------------------------------------------------------
def _ref_emd_decoder_block(x, w, k, s, p, op, inner_layer, eps=1e-5):
    B, Cin, H, W = x.shape
    Cout = w.shape[1]
    out_h = (H - 1) * s - 2 * p + k + op
    out_w = (W - 1) * s - 2 * p + k + op
    FH = (H - 1) * s + k + max(0, op - p)
    FW = (W - 1) * s + k + max(0, op - p)
    full = jnp.zeros((B, Cout, FH, FW), jnp.float32)
    for kh in range(k):
        for kw in range(k):
            contrib = jnp.einsum("bihw,io->bohw", x, w[:, :, kh, kw])
            full = full.at[:, :, kh:kh + (H - 1) * s + 1:s,
                                 kw:kw + (W - 1) * s + 1:s].add(contrib)
    y = full[:, :, p:p + out_h, p:p + out_w]
    if inner_layer:
        mean = jnp.mean(y, axis=(0, 2, 3), keepdims=True)
        var = jnp.mean(jnp.square(y - mean), axis=(0, 2, 3), keepdims=True)
        y = jnp.maximum((y - mean) / jnp.sqrt(var + eps), 0.0)
    return y


# ----------------------------------------------------------------------------
# demo
# ----------------------------------------------------------------------------
if __name__ == "__main__":
    key = jax.random.PRNGKey(0)
    B, Cin, Cout, H, W = 2, 64, 32, 16, 16
    k, s, p, add = 3, 2, 1, 1                       # doubles spatial resolution

    kw_key, kx_key = jax.random.split(key)
    weight = jax.random.normal(kw_key, (Cin, Cout, k, k), jnp.float32) * 0.05
    x = jax.random.normal(kx_key, (B, Cin, H, W), jnp.float32)

    out_h = (H - 1) * s - 2 * p + k + add
    out_w = (W - 1) * s - 2 * p + k + add

    # inner_layer=True: ConvTranspose + BatchNorm + ReLU
    block = EMDDecoderBlockPallas(weight, k, s, p, add, inner_layer=True)
    out = jax.block_until_ready(block(x))
    assert out.shape == (B, Cout, out_h, out_w), out.shape
    assert bool(jnp.all(jnp.isfinite(out)))
    ref = _ref_emd_decoder_block(x, weight, k, s, p, add, True)
    err = float(jnp.max(jnp.abs(out - ref)))
    assert err < 5e-2, f"max abs err vs reference (inner): {err}"

    # inner_layer=False: bare ConvTranspose
    block_nb = EMDDecoderBlockPallas(weight, k, s, p, add, inner_layer=False)
    out_nb = jax.block_until_ready(block_nb(x))
    assert out_nb.shape == (B, Cout, out_h, out_w), out_nb.shape
    ref_nb = _ref_emd_decoder_block(x, weight, k, s, p, add, False)
    err_nb = float(jnp.max(jnp.abs(out_nb - ref_nb)))
    assert err_nb < 5e-2, f"max abs err vs reference (no BN): {err_nb}"

    print("KERNEL_OK")
</pallas_src>

<mosaic_0001>
module attributes {stable_mosaic.version = 11 : i64} {
  func.func @_matmul_stats_kernel(%arg0: i32, %arg1: memref<256x256xf32, #tpu.memory_space<vmem>>, %arg2: memref<256x128xf32, #tpu.memory_space<vmem>>, %arg3: memref<256x128xf32, #tpu.memory_space<vmem>>, %arg4: memref<1x8x128xf32, #tpu.memory_space<vmem>>, %arg5: memref<1x8x128xf32, #tpu.memory_space<vmem>>) attributes {dimension_semantics = [#tpu.dimension_semantics<parallel>], iteration_bounds = array<i64: 2>, scalar_prefetch = 0 : i64, scratch_operands = 0 : i64, tpu.core_type = #tpu.core_type<tc>, window_params = [{transform_indices = @transform_0, window_bounds = array<i64: 256, 256>}, {pipeline_mode = #tpu.pipeline_mode<synchronous>, transform_indices = @transform_1, window_bounds = array<i64: 256, 128>}, {transform_indices = @transform_2, window_bounds = array<i64: 256, 128>}, {transform_indices = @transform_3, window_bounds = array<i64: 1, 8, 128>}, {transform_indices = @transform_4, window_bounds = array<i64: 1, 8, 128>}]} {
    %c0 = arith.constant 0 : index
    %c0_0 = arith.constant 0 : index
    %0 = vector.load %arg1[%c0, %c0_0] : memref<256x256xf32, #tpu.memory_space<vmem>>, vector<256x256xf32>
    %c0_1 = arith.constant 0 : index
    %c0_2 = arith.constant 0 : index
    %1 = vector.load %arg2[%c0_1, %c0_2] : memref<256x128xf32, #tpu.memory_space<vmem>>, vector<256x128xf32>
    %cst = arith.constant dense<0.000000e+00> : vector<256x128xf32>
    %2 = tpu.matmul %0, %1, %cst {dimension_numbers = #tpu.dot_dimension_numbers<[1], [0], [0], [1], [0, 0, 1, 1], [], []>} : vector<256x256xf32>, vector<256x128xf32>, vector<256x128xf32> -> vector<256x128xf32>
    %c0_3 = arith.constant 0 : index
    %c0_4 = arith.constant 0 : index
    %3 = vector.load %arg3[%c0_3, %c0_4] : memref<256x128xf32, #tpu.memory_space<vmem>>, vector<256x128xf32>
    tpu.vector_store %arg3[%c0_3, %c0_4], %2 {strides = array<i32>} : memref<256x128xf32, #tpu.memory_space<vmem>>, vector<256x128xf32>,
    %cst_5 = arith.constant dense<0.000000e+00> : vector<128xf32>
    %4 = vector.multi_reduction <add>, %2, %cst_5 [0] : vector<256x128xf32> to vector<128xf32>
    %5 = vector.shape_cast %4 : vector<128xf32> to vector<1x128xf32>
    %6 = arith.mulf %2, %2 : vector<256x128xf32>
    %cst_6 = arith.constant dense<0.000000e+00> : vector<128xf32>
    %7 = vector.multi_reduction <add>, %6, %cst_6 [0] : vector<256x128xf32> to vector<128xf32>
    %8 = vector.shape_cast %7 : vector<128xf32> to vector<1x128xf32>
    %9 = vector.shape_cast %5 : vector<1x128xf32> to vector<1x1x128xf32>
    %10 = vector.shape_cast %9 : vector<1x1x128xf32> to vector<1x1x128xf32>
    %11 = vector.broadcast %10 : vector<1x1x128xf32> to vector<1x8x128xf32>
    %c0_7 = arith.constant 0 : index
    %c0_8 = arith.constant 0 : index
    %c0_9 = arith.constant 0 : index
    %12 = vector.load %arg4[%c0_7, %c0_8, %c0_9] : memref<1x8x128xf32, #tpu.memory_space<vmem>>, vector<1x8x128xf32>
    tpu.vector_store %arg4[%c0_7, %c0_8, %c0_9], %11 {strides = array<i32>} : memref<1x8x128xf32, #tpu.memory_space<vmem>>, vector<1x8x128xf32>,
    %13 = vector.shape_cast %8 : vector<1x128xf32> to vector<1x1x128xf32>
    %14 = vector.shape_cast %13 : vector<1x1x128xf32> to vector<1x1x128xf32>
    %15 = vector.broadcast %14 : vector<1x1x128xf32> to vector<1x8x128xf32>
    %c0_10 = arith.constant 0 : index
    %c0_11 = arith.constant 0 : index
    %c0_12 = arith.constant 0 : index
    %16 = vector.load %arg5[%c0_10, %c0_11, %c0_12] : memref<1x8x128xf32, #tpu.memory_space<vmem>>, vector<1x8x128xf32>
    tpu.vector_store %arg5[%c0_10, %c0_11, %c0_12], %15 {strides = array<i32>} : memref<1x8x128xf32, #tpu.memory_space<vmem>>, vector<1x8x128xf32>,
    return
  }
  func.func @transform_0(%arg0: i32) -> (i32, i32) {
    %c0_i32 = arith.constant 0 : i32
    %c0_i32_0 = arith.constant 0 : i32
    return %arg0, %c0_i32 : i32, i32
  }
  func.func @transform_1(%arg0: i32) -> (i32, i32) {
    %c0_i32 = arith.constant 0 : i32
    %c0_i32_0 = arith.constant 0 : i32
    %c0_i32_1 = arith.constant 0 : i32
    return %c0_i32, %c0_i32_0 : i32, i32
  }
  func.func @transform_2(%arg0: i32) -> (i32, i32) {
    %c0_i32 = arith.constant 0 : i32
    %c0_i32_0 = arith.constant 0 : i32
    return %arg0, %c0_i32 : i32, i32
  }
  func.func @transform_3(%arg0: i32) -> (i32, i32, i32) {
    %c0_i32 = arith.constant 0 : i32
    %c0_i32_0 = arith.constant 0 : i32
    %c0_i32_1 = arith.constant 0 : i32
    return %arg0, %c0_i32, %c0_i32_0 : i32, i32, i32
  }
  func.func @transform_4(%arg0: i32) -> (i32, i32, i32) {
    %c0_i32 = arith.constant 0 : i32
    %c0_i32_0 = arith.constant 0 : i32
    %c0_i32_1 = arith.constant 0 : i32
    return %arg0, %c0_i32, %c0_i32_0 : i32, i32, i32
  }
}

module attributes {stable_mosaic.version = 11 : i64} {
  func.func @_affine_relu_kernel(%arg0: i32, %arg1: memref<256x128xf32, #tpu.memory_space<vmem>>, %arg2: memref<1x128xf32, #tpu.memory_space<vmem>>, %arg3: memref<1x128xf32, #tpu.memory_space<vmem>>, %arg4: memref<256x128xf32, #tpu.memory_space<vmem>>) attributes {dimension_semantics = [#tpu.dimension_semantics<parallel>], iteration_bounds = array<i64: 2>, scalar_prefetch = 0 : i64, scratch_operands = 0 : i64, tpu.core_type = #tpu.core_type<tc>, window_params = [{transform_indices = @transform_0, window_bounds = array<i64: 256, 128>}, {pipeline_mode = #tpu.pipeline_mode<synchronous>, transform_indices = @transform_1, window_bounds = array<i64: 1, 128>}, {pipeline_mode = #tpu.pipeline_mode<synchronous>, transform_indices = @transform_2, window_bounds = array<i64: 1, 128>}, {transform_indices = @transform_3, window_bounds = array<i64: 256, 128>}]} {
    %c0 = arith.constant 0 : index
    %c0_0 = arith.constant 0 : index
    %0 = vector.load %arg1[%c0, %c0_0] : memref<256x128xf32, #tpu.memory_space<vmem>>, vector<256x128xf32>
    %c0_1 = arith.constant 0 : index
    %c0_2 = arith.constant 0 : index
    %1 = vector.load %arg2[%c0_1, %c0_2] : memref<1x128xf32, #tpu.memory_space<vmem>>, vector<1x128xf32>
    %2 = vector.broadcast %1 : vector<1x128xf32> to vector<256x128xf32>
    %3 = arith.mulf %0, %2 : vector<256x128xf32>
    %c0_3 = arith.constant 0 : index
    %c0_4 = arith.constant 0 : index
    %4 = vector.load %arg3[%c0_3, %c0_4] : memref<1x128xf32, #tpu.memory_space<vmem>>, vector<1x128xf32>
    %5 = vector.broadcast %4 : vector<1x128xf32> to vector<256x128xf32>
    %6 = arith.addf %3, %5 : vector<256x128xf32>
    %cst = arith.constant 0.000000e+00 : f32
    %7 = vector.broadcast %cst : f32 to vector<256x128xf32>
    %8 = arith.maximumf %6, %7 : vector<256x128xf32>
    %c0_5 = arith.constant 0 : index
    %c0_6 = arith.constant 0 : index
    %9 = vector.load %arg4[%c0_5, %c0_6] : memref<256x128xf32, #tpu.memory_space<vmem>>, vector<256x128xf32>
    tpu.vector_store %arg4[%c0_5, %c0_6], %8 {strides = array<i32>} : memref<256x128xf32, #tpu.memory_space<vmem>>, vector<256x128xf32>,
    return
  }
  func.func @transform_0(%arg0: i32) -> (i32, i32) {
    %c0_i32 = arith.constant 0 : i32
    %c0_i32_0 = arith.constant 0 : i32
    return %arg0, %c0_i32 : i32, i32
  }
  func.func @transform_1(%arg0: i32) -> (i32, i32) {
    %c0_i32 = arith.constant 0 : i32
    %c0_i32_0 = arith.constant 0 : i32
    %c0_i32_1 = arith.constant 0 : i32
    return %c0_i32, %c0_i32_0 : i32, i32
  }
  func.func @transform_2(%arg0: i32) -> (i32, i32) {
    %c0_i32 = arith.constant 0 : i32
    %c0_i32_0 = arith.constant 0 : i32
    %c0_i32_1 = arith.constant 0 : i32
    return %c0_i32, %c0_i32_0 : i32, i32
  }
  func.func @transform_3(%arg0: i32) -> (i32, i32) {
    %c0_i32 = arith.constant 0 : i32
    %c0_i32_0 = arith.constant 0 : i32
    return %arg0, %c0_i32 : i32, i32
  }
}

</mosaic_0001>

<bundles_post_ra>
// kernel: tile.18
= control target key start
LH: loop header
LB: loop body
LE: loop exit
PB: predicated region body
PF: predicated region fallthrough
CT: control target
= control target key end

     0   :  { %s22_s0 = inlined_call_operand.vmem [shape: f32[32], index: 0, kind: input, shape index: {}]   ;;  %s23_s1 = inlined_call_operand.vmem [shape: f32[4,32], index: 1, kind: output, shape index: {}]  }
   0x1   :  { %v4_v0 = vld [vmem:[%s22_s0] ss:$0 sm:$0xff] }
   0x2   :  { %5 = vst [vmem:[%s23_s1] sm:$0xf] %v4_v0 }

// kernel: tile.19
= control target key start
LH: loop header
LB: loop body
LE: loop exit
PB: predicated region body
PF: predicated region fallthrough
CT: control target
= control target key end

     0   :  { %vm8_vm0 = vcmask 261120   ;;  %s40_s8 = smov 32   ;;  %s41_s9 = smov 64   ;;  %vm14_vm1 = vcmask 1048320   ;;  %vm20_vm2 = vcmask 785920   ;;  %vm26_vm3 = vcmask 523520   ;;  %s58_s0 = inlined_call_operand.vmem [shape: f32[4,32], index: 0, kind: input, shape index: {}]   ;;  %s59_s1 = inlined_call_operand.vmem [shape: f32[1,128], index: 1, kind: output, shape index: {}]  }
   0x1   :  { %v5_v0 = vld [vmem:[%s58_s0] sm:$0xf]  ;;  %s39_s0 = smov 96  }
   0x2   :  { %6 = vst [vmem:[#allocation1] sm:$0xf] %v5_v0 }
   0x9   :  { %v11_v1 = vld [vmem:[#allocation1 + $0x3] sm:$0x1]   ;;  %v23_v2 = vld [vmem:[#allocation1 + $0x1] sm:$0x1]   ;;  %v7_v3 = vld [vmem:[#allocation1] sm:$0x1]  }
   0xa   :  { %12 = vrot.lane.b32.xlu0 %v11_v1, %s39_s0  ;;  %24 = vrot.lane.b32.xlu1 %v23_v2, %s40_s8  ;;  %v17_v4 = vld [vmem:[#allocation1 + $0x2] sm:$0x1]   ;;  %9 = vst.msk [vmem:[#allocation0] sm:$0x1] %vm8_vm0, %v7_v3  }
   0xe   :  { %18 = vrot.lane.b32.xlu0 %v17_v4, %s41_s9 }
  0x7c   :  { %v13_v5 = vpop.permute.xlu0 %12   ;;  %v25_v6 = vpop.permute.xlu1 %24  }
  0x7d   :  { %15 = vst.msk [vmem:[#allocation0] sm:$0x1] %vm14_vm1, %v13_v5  }
  0x80   :  { %v19_v7 = vpop.permute.xlu0 %18  }
  0x81   :  { %21 = vst.msk [vmem:[#allocation0] sm:$0x1] %vm20_vm2, %v19_v7  }
  0x82   :  { %27 = vst.msk [vmem:[#allocation0] sm:$0x1] %vm26_vm3, %v25_v6  }
  0x89   :  { %v32_v8 = vld [vmem:[#allocation0] sm:$0x1] }
  0x8a   :  { %35 = vst [vmem:[%s59_s1] sm:$0x1] %v32_v8 }

// kernel: _forward.2
= control target key start
LH: loop header
LB: loop body
LE: loop exit
PB: predicated region body
PF: predicated region fallthrough
CT: control target
= control target key end

     0   :  { %s926_s15 = smov 0   ;;  %s1302_s0 = inlined_call_operand.vmem [shape: f32[512,256], index: 0, kind: input, shape index: {}]   ;;  %s1303_s1 = inlined_call_operand.vmem [shape: f32[256,128], index: 1, kind: input, shape index: {}]   ;;  %s1304_s2 = inlined_call_operand.vmem [shape: f32[512,128], index: 2, kind: output, shape index: {0}]   ;;  %s1305_s3 = inlined_call_operand.vmem [shape: f32[2,8,128], index: 3, kind: output, shape index: {1}]   ;;  %s1306_s4 = inlined_call_operand.vmem [shape: f32[2,8,128], index: 4, kind: output, shape index: {2}]  }
   0x1 LB: > { %s932_s16 = sadd.s32 4294967295, %s898_s15   ;;  %p808_p0 = scmp.ge.s32.totalorder %s898_s15, 1  ;;  %s898_s15 = sphi %s926_s15, %s15_s15  }
   0x2   : > { %p169_p1 = scmp.lt.s32.totalorder %s898_s15, 3 }
   0x4   : > { %p170_p2 = pnand %p808_p0, %p169_p1 }
   0x5   : > { %s809_s9 = sshll.u32 (!%p170_p2), %s932_s16, 5  ;;  %p217_p4 = scmp.lt.s32.totalorder (!%p170_p2), %s932_s16, 1 }
   0x6   : > { %173 = sbr.rel (%p170_p2) target bundleno = 378 (0x17a), region = 28  ;;  %p205_p3 = scmp.lt.s32.totalorder (!%p170_p2), %s809_s9, 63 }
   0xb   : > { %v304_v0 = vld [vmem:[%s1303_s1 + $0x78] sm:$0xff]  ;;  %v900_v1 = vmov 0.0   ;;  %v303_v2 = vld [vmem:[%s1303_s1 + $0x70] sm:$0xff]  ;;  %v302_v3 = vld [vmem:[%s1303_s1 + $0x68] sm:$0xff]  ;;  %s1308_s9 = smov (!%p205_p3, %s809_s9), 63  ;;  %s1310_s16 = smov (!%p217_p4, %s932_s16), 1 }
   0xc   : > { %321 = vmatprep.subr.mxu0 %v900_v1  ;;  %819 = vmatprep.subr.mxu1 %v900_v1  ;;  %v301_v4 = vld [vmem:[%s1303_s1 + $0x60] sm:$0xff]  ;;  %v300_v5 = vld [vmem:[%s1303_s1 + $0x58] sm:$0xff]  ;;  %v299_v6 = vld [vmem:[%s1303_s1 + $0x50] sm:$0xff]  ;;  %s818_s22 = sshll.u32 %s1308_s9, 4  ;;  %s813_s17 = sshll.u32 %s1308_s9, 3 }
   0xd   : > { %322 = vmatpush1.msra.mxu0 %v304_v0  ;;  %851 = vmatpush1.msra.mxu1 %v304_v0  ;;  %v298_v7 = vld [vmem:[%s1303_s1 + $0x48] sm:$0xff]  ;;  %v297_v8 = vld [vmem:[%s1303_s1 + $0x40] sm:$0xff]  ;;  %v296_v9 = vld [vmem:[%s1303_s1 + $0x38] sm:$0xff]  ;;  %s1021_s29 = scalar_lea.vmem %s1302_s0, %s818_s22  ;;  %s1173_s20 = scalar_lea.vmem %s1304_s2, %s813_s17 }
   0xe   : > { %323 = vmatprep.subr.mxu0 %v900_v1  ;;  %820 = vmatprep.subr.mxu1 %v900_v1  ;;  %v295_v10 = vld [vmem:[%s1303_s1 + $0x30] sm:$0xff]  ;;  %v294_v11 = vld [vmem:[%s1303_s1 + $0x28] sm:$0xff]  ;;  %v293_v12 = vld [vmem:[%s1303_s1 + $0x20] sm:$0xff]  ;;  %s814_s9 = sshll.u32 %s1310_s16, 3 }
   0xf   : > { %324 = vmatpush1.msra.mxu0 %v303_v2  ;;  %852 = vmatpush1.msra.mxu1 %v303_v2  ;;  %v292_v13 = vld [vmem:[%s1303_s1 + $0x18] sm:$0xff]  ;;  %v291_v14 = vld [vmem:[%s1303_s1 + $0x10] sm:$0xff]  ;;  %v290_v15 = vld [vmem:[%s1303_s1 + $0x8] sm:$0xff]  ;;  %s220_s22 = scalar_lea.vmem %s1305_s3, %s814_s9  ;;  %s224_s25 = scalar_lea.vmem %s1306_s4, %s814_s9 }
  0x10   : > { %325 = vmatprep.subr.mxu0 %v900_v1  ;;  %821 = vmatprep.subr.mxu1 %v900_v1  ;;  %v289_v16 = vld [vmem:[%s1303_s1] sm:$0xff]  ;;  %v320_v17 = vld [vmem:[%s1303_s1 + $0xf8] sm:$0xff]  ;;  %v226_v18 = vld [vmem:[%s1021_s29 + $0x8] sm:$0xff] }
  0x11   : > { %326 = vmatpush1.msra.mxu0 %v302_v3  ;;  %853 = vmatpush1.msra.mxu1 %v302_v3  ;;  %v319_v19 = vld [vmem:[%s1303_s1 + $0xf0] sm:$0xff]  ;;  %v318_v20 = vld [vmem:[%s1303_s1 + $0xe8] sm:$0xff]  ;;  %v317_v21 = vld [vmem:[%s1303_s1 + $0xe0] sm:$0xff] }
  0x12   : > { %327 = vmatprep.subr.mxu0 %v900_v1  ;;  %822 = vmatprep.subr.mxu1 %v900_v1  ;;  %v316_v22 = vld [vmem:[%s1303_s1 + $0xd8] sm:$0xff]  ;;  %v315_v23 = vld [vmem:[%s1303_s1 + $0xd0] sm:$0xff]  ;;  %v314_v24 = vld [vmem:[%s1303_s1 + $0xc8] sm:$0xff] }
  0x13   : > { %328 = vmatpush1.msra.mxu0 %v301_v4  ;;  %854 = vmatpush1.msra.mxu1 %v301_v4  ;;  %v313_v25 = vld [vmem:[%s1303_s1 + $0xc0] sm:$0xff]  ;;  %v312_v26 = vld [vmem:[%s1303_s1 + $0xb8] sm:$0xff]  ;;  %v311_v27 = vld [vmem:[%s1303_s1 + $0xb0] sm:$0xff] }
  0x14   : > { %329 = vmatprep.subr.mxu0 %v900_v1  ;;  %823 = vmatprep.subr.mxu1 %v900_v1  ;;  %v310_v28 = vld [vmem:[%s1303_s1 + $0xa8] sm:$0xff]  ;;  %v309_v29 = vld [vmem:[%s1303_s1 + $0xa0] sm:$0xff]  ;;  %v308_v30 = vld [vmem:[%s1303_s1 + $0x98] sm:$0xff] }
  0x15   : > { %330 = vmatpush1.msra.mxu0 %v300_v5  ;;  %855 = vmatpush1.msra.mxu1 %v300_v5  ;;  %v307_v31 = vld [vmem:[%s1303_s1 + $0x90] sm:$0xff]  ;;  %v306_v32 = vld [vmem:[%s1303_s1 + $0x88] sm:$0xff]  ;;  %v305_v33 = vld [vmem:[%s1303_s1 + $0x80] sm:$0xff] }
  0x16   : > { %331 = vmatprep.subr.mxu0 %v900_v1  ;;  %824 = vmatprep.subr.mxu1 %v900_v1  ;;  %v225_v34 = vld [vmem:[%s1021_s29] sm:$0xff]  ;;  %v228_v35 = vld [vmem:[%s1021_s29 + $0x18] sm:$0xff]  ;;  %v258_v36 = vld [vmem:[%s1021_s29 + $0x108] sm:$0xff] }
  0x17   : > { %332 = vmatpush1.msra.mxu0 %v299_v6  ;;  %856 = vmatpush1.msra.mxu1 %v299_v6  ;;  %v257_v37 = vld [vmem:[%s1021_s29 + $0x100] sm:$0xff]  ;;  %v260_v38 = vld [vmem:[%s1021_s29 + $0x118] sm:$0xff]  ;;  %v227_v39 = vld [vmem:[%s1021_s29 + $0x10] sm:$0xff] }
  0x18   : > { %333 = vmatprep.subr.mxu0 %v900_v1  ;;  %825 = vmatprep.subr.mxu1 %v900_v1  ;;  %v230_v40 = vld [vmem:[%s1021_s29 + $0x28] sm:$0xff]  ;;  %v259_v41 = vld [vmem:[%s1021_s29 + $0x110] sm:$0xff]  ;;  %v229_v43 = vld [vmem:[%s1021_s29 + $0x20] sm:$0xff] }
  0x19   : > { %334 = vmatpush1.msra.mxu0 %v298_v7  ;;  %857 = vmatpush1.msra.mxu1 %v298_v7  ;;  %v262_v42 = vld [vmem:[%s1021_s29 + $0x128] sm:$0xff]  ;;  %v232_v44 = vld [vmem:[%s1021_s29 + $0x38] sm:$0xff]  ;;  %v261_v45 = vld [vmem:[%s1021_s29 + $0x120] sm:$0xff] }
  0x1a   : > { %335 = vmatprep.subr.mxu0 %v900_v1  ;;  %826 = vmatprep.subr.mxu1 %v900_v1  ;;  %v264_v46 = vld [vmem:[%s1021_s29 + $0x138] sm:$0xff]  ;;  %v231_v47 = vld [vmem:[%s1021_s29 + $0x30] sm:$0xff]  ;;  %v234_v48 = vld [vmem:[%s1021_s29 + $0x48] sm:$0xff] }
  0x1b   : > { %336 = vmatpush1.msra.mxu0 %v297_v8  ;;  %858 = vmatpush1.msra.mxu1 %v297_v8  ;;  %v263_v49 = vld [vmem:[%s1021_s29 + $0x130] sm:$0xff]  ;;  %v266_v50 = vld [vmem:[%s1021_s29 + $0x148] sm:$0xff]  ;;  %v233_v51 = vld [vmem:[%s1021_s29 + $0x40] sm:$0xff] }
  0x1c   : > { %337 = vmatprep.subr.mxu0 %v900_v1  ;;  %827 = vmatprep.subr.mxu1 %v900_v1  ;;  %v236_v52 = vld [vmem:[%s1021_s29 + $0x58] sm:$0xff]  ;;  %v265_v53 = vld [vmem:[%s1021_s29 + $0x140] sm:$0xff]  ;;  %v235_v55 = vld [vmem:[%s1021_s29 + $0x50] sm:$0xff] }
  0x1d   : > { %338 = vmatpush1.msra.mxu0 %v296_v9  ;;  %859 = vmatpush1.msra.mxu1 %v296_v9  ;;  %v268_v54 = vld [vmem:[%s1021_s29 + $0x158] sm:$0xff]  ;;  %v238_v56 = vld [vmem:[%s1021_s29 + $0x68] sm:$0xff]  ;;  %v267_v57 = vld [vmem:[%s1021_s29 + $0x150] sm:$0xff] }
  0x1e   : > { %339 = vmatprep.subr.mxu0 %v900_v1  ;;  %828 = vmatprep.subr.mxu1 %v900_v1  ;;  %v270_v58 = vld [vmem:[%s1021_s29 + $0x168] sm:$0xff]  ;;  %v237_v59 = vld [vmem:[%s1021_s29 + $0x60] sm:$0xff]  ;;  %v240_v60 = vld [vmem:[%s1021_s29 + $0x78] sm:$0xff] }
  0x1f   : > { %340 = vmatpush1.msra.mxu0 %v295_v10  ;;  %860 = vmatpush1.msra.mxu1 %v295_v10  ;;  %v269_v61 = vld [vmem:[%s1021_s29 + $0x160] sm:$0xff]  ;;  %v272_v62 = vld [vmem:[%s1021_s29 + $0x178] sm:$0xff]  ;;  %v239_v63 = vld [vmem:[%s1021_s29 + $0x70] sm:$0xff] }
  0x20   : > { %341 = vmatprep.subr.mxu0 %v900_v1  ;;  %829 = vmatprep.subr.mxu1 %v900_v1  ;;  %v242_v0 = vld [vmem:[%s1021_s29 + $0x88] sm:$0xff]  ;;  %v241_v3 = vld [vmem:[%s1021_s29 + $0x80] sm:$0xff]  ;;  %v244_v4 = vld [vmem:[%s1021_s29 + $0x98] sm:$0xff] }
  0x21   : > { %342 = vmatpush1.msra.mxu0 %v294_v11  ;;  %861 = vmatpush1.msra.mxu1 %v294_v11  ;;  %v274_v2 = vld [vmem:[%s1021_s29 + $0x188] sm:$0xff]  ;;  %v273_v5 = vld [vmem:[%s1021_s29 + $0x180] sm:$0xff]  ;;  %v276_v6 = vld [vmem:[%s1021_s29 + $0x198] sm:$0xff] }
  0x22   : > { %343 = vmatprep.subr.mxu0 %v900_v1  ;;  %830 = vmatprep.subr.mxu1 %v900_v1  ;;  %v243_v7 = vld [vmem:[%s1021_s29 + $0x90] sm:$0xff]  ;;  %v246_v8 = vld [vmem:[%s1021_s29 + $0xa8] sm:$0xff]  ;;  %v245_v11 = vld [vmem:[%s1021_s29 + $0xa0] sm:$0xff] }
  0x23   : > { %344 = vmatpush1.msra.mxu0 %v293_v12  ;;  %862 = vmatpush1.msra.mxu1 %v293_v12  ;;  %v275_v9 = vld [vmem:[%s1021_s29 + $0x190] sm:$0xff]  ;;  %v278_v10 = vld [vmem:[%s1021_s29 + $0x1a8] sm:$0xff]  ;;  %v248_v12 = vld [vmem:[%s1021_s29 + $0xb8] sm:$0xff] }
  0x24   : > { %345 = vmatprep.subr.mxu0 %v900_v1  ;;  %831 = vmatprep.subr.mxu1 %v900_v1 }
  0x25   : > { %346 = vmatpush1.msra.mxu0 %v292_v13  ;;  %863 = vmatpush1.msra.mxu1 %v292_v13  ;;  %v277_v13 = vld [vmem:[%s1021_s29 + $0x1a0] sm:$0xff] }
  0x26   : > { %347 = vmatprep.subr.mxu0 %v900_v1  ;;  %832 = vmatprep.subr.mxu1 %v900_v1 }
  0x27   : > { %348 = vmatpush1.msra.mxu0 %v291_v14  ;;  %864 = vmatpush1.msra.mxu1 %v291_v14  ;;  %v280_v14 = vld [vmem:[%s1021_s29 + $0x1b8] sm:$0xff] }
  0x28   : > { %349 = vmatprep.subr.mxu0 %v900_v1  ;;  %833 = vmatprep.subr.mxu1 %v900_v1 }
  0x29   : > { %350 = vmatpush1.msra.mxu0 %v290_v15  ;;  %865 = vmatpush1.msra.mxu1 %v290_v15  ;;  %v247_v15 = vld [vmem:[%s1021_s29 + $0xb0] sm:$0xff] }
  0x2a   : > { %351 = vmatprep.subr.mxu0 %v900_v1  ;;  %834 = vmatprep.subr.mxu1 %v900_v1 }
  0x2b   : > { %352 = vmatpush1.msra.mxu0 %v289_v16  ;;  %866 = vmatpush1.msra.mxu1 %v289_v16  ;;  %v250_v16 = vld [vmem:[%s1021_s29 + $0xc8] sm:$0xff] }
  0x2c   : > { %353 = vmatprep.subr.mxu0 %v900_v1  ;;  %835 = vmatprep.subr.mxu1 %v900_v1 }
  0x2d   : > { %354 = vmatpush2.msra.mxu0 %v320_v17  ;;  %867 = vmatpush2.msra.mxu1 %v320_v17  ;;  %v279_v17 = vld [vmem:[%s1021_s29 + $0x1b0] sm:$0xff] }
  0x2e   : > { %355 = vmatprep.subr.mxu0 %v900_v1  ;;  %385 = vmatprep.mubr.f32.mxu0 %v226_v18  ;;  %v282_v18 = vld [vmem:[%s1021_s29 + $0x1c8] sm:$0xff] }
  0x2f   : > { %356 = vmatpush2.msra.mxu0 %v319_v19  ;;  %836 = vmatprep.subr.mxu1 %v900_v1 }
  0x30   : > { %357 = vmatprep.subr.mxu0 %v900_v1  ;;  %868 = vmatpush2.msra.mxu1 %v319_v19  ;;  %v249_v19 = vld [vmem:[%s1021_s29 + $0xc0] sm:$0xff] }
  0x31   : > { %358 = vmatpush2.msra.mxu0 %v318_v20  ;;  %837 = vmatprep.subr.mxu1 %v900_v1 }
  0x32   : > { %359 = vmatprep.subr.mxu0 %v900_v1  ;;  %869 = vmatpush2.msra.mxu1 %v318_v20  ;;  %v252_v20 = vld [vmem:[%s1021_s29 + $0xd8] sm:$0xff] }
  0x33   : > { %360 = vmatpush2.msra.mxu0 %v317_v21  ;;  %838 = vmatprep.subr.mxu1 %v900_v1 }
  0x34   : > { %361 = vmatprep.subr.mxu0 %v900_v1  ;;  %870 = vmatpush2.msra.mxu1 %v317_v21  ;;  %v281_v21 = vld [vmem:[%s1021_s29 + $0x1c0] sm:$0xff] }
  0x35   : > { %362 = vmatpush2.msra.mxu0 %v316_v22  ;;  %839 = vmatprep.subr.mxu1 %v900_v1 }
  0x36   : > { %363 = vmatprep.subr.mxu0 %v900_v1  ;;  %871 = vmatpush2.msra.mxu1 %v316_v22  ;;  %v284_v22 = vld [vmem:[%s1021_s29 + $0x1d8] sm:$0xff] }
  0x37   : > { %364 = vmatpush2.msra.mxu0 %v315_v23  ;;  %840 = vmatprep.subr.mxu1 %v900_v1 }
  0x38   : > { %365 = vmatprep.subr.mxu0 %v900_v1  ;;  %872 = vmatpush2.msra.mxu1 %v315_v23  ;;  %v251_v23 = vld [vmem:[%s1021_s29 + $0xd0] sm:$0xff] }
  0x39   : > { %366 = vmatpush2.msra.mxu0 %v314_v24  ;;  %841 = vmatprep.subr.mxu1 %v900_v1 }
  0x3a   : > { %367 = vmatprep.subr.mxu0 %v900_v1  ;;  %873 = vmatpush2.msra.mxu1 %v314_v24  ;;  %v254_v24 = vld [vmem:[%s1021_s29 + $0xe8] sm:$0xff] }
  0x3b   : > { %368 = vmatpush2.msra.mxu0 %v313_v25  ;;  %842 = vmatprep.subr.mxu1 %v900_v1 }
  0x3c   : > { %369 = vmatprep.subr.mxu0 %v900_v1  ;;  %874 = vmatpush2.msra.mxu1 %v313_v25  ;;  %v283_v25 = vld [vmem:[%s1021_s29 + $0x1d0] sm:$0xff] }
  0x3d   : > { %370 = vmatpush2.msra.mxu0 %v312_v26  ;;  %843 = vmatprep.subr.mxu1 %v900_v1 }
  0x3e   : > { %371 = vmatprep.subr.mxu0 %v900_v1  ;;  %875 = vmatpush2.msra.mxu1 %v312_v26  ;;  %v286_v26 = vld [vmem:[%s1021_s29 + $0x1e8] sm:$0xff] }
  0x3f   : > { %372 = vmatpush2.msra.mxu0 %v311_v27  ;;  %844 = vmatprep.subr.mxu1 %v900_v1 }
  0x40   : > { %373 = vmatprep.subr.mxu0 %v900_v1  ;;  %876 = vmatpush2.msra.mxu1 %v311_v27  ;;  %v253_v27 = vld [vmem:[%s1021_s29 + $0xe0] sm:$0xff] }
  0x41   : > { %374 = vmatpush2.msra.mxu0 %v310_v28  ;;  %845 = vmatprep.subr.mxu1 %v900_v1 }
  0x42   : > { %375 = vmatprep.subr.mxu0 %v900_v1  ;;  %877 = vmatpush2.msra.mxu1 %v310_v28  ;;  %v256_v28 = vld [vmem:[%s1021_s29 + $0xf8] sm:$0xff] }
  0x43   : > { %376 = vmatpush2.msra.mxu0 %v309_v29  ;;  %846 = vmatprep.subr.mxu1 %v900_v1 }
  0x44   : > { %377 = vmatprep.subr.mxu0 %v900_v1  ;;  %878 = vmatpush2.msra.mxu1 %v309_v29  ;;  %v285_v29 = vld [vmem:[%s1021_s29 + $0x1e0] sm:$0xff] }
  0x45   : > { %378 = vmatpush2.msra.mxu0 %v308_v30  ;;  %847 = vmatprep.subr.mxu1 %v900_v1 }
  0x46   : > { %379 = vmatprep.subr.mxu0 %v900_v1  ;;  %879 = vmatpush2.msra.mxu1 %v308_v30  ;;  %v288_v30 = vld [vmem:[%s1021_s29 + $0x1f8] sm:$0xff] }
  0x47   : > { %380 = vmatpush2.msra.mxu0 %v307_v31  ;;  %848 = vmatprep.subr.mxu1 %v900_v1 }
  0x48   : > { %381 = vmatprep.subr.mxu0 %v900_v1  ;;  %880 = vmatpush2.msra.mxu1 %v307_v31  ;;  %v255_v31 = vld [vmem:[%s1021_s29 + $0xf0] sm:$0xff] }
  0x49   : > { %382 = vmatpush2.msra.mxu0 %v306_v32  ;;  %849 = vmatprep.subr.mxu1 %v900_v1 }
  0x4a   : > { %383 = vmatprep.subr.mxu0 %v900_v1  ;;  %881 = vmatpush2.msra.mxu1 %v306_v32  ;;  %v287_v32 = vld [vmem:[%s1021_s29 + $0x1f0] sm:$0xff] }
  0x4b   : > { %384 = vmatpush2.msra.mxu0 %v305_v33  ;;  %850 = vmatprep.subr.mxu1 %v900_v1  ;;  %v271_v1 = vld [vmem:[%s1021_s29 + $0x170] sm:$0xff] }
  0x4c   : > { %386 = vmatmul.mubr.f32.vlgmr.msra.gmra.mxu0 %v225_v34  ;;  %882 = vmatpush2.msra.mxu1 %v305_v33 }
  0x4d   : > { %390 = vmatprep.mubr.f32.mxu0 %v228_v35  ;;  %465 = vmatprep.mubr.f32.mxu1 %v258_v36 }
  0x4e   : > { %466 = vmatmul.mubr.f32.vlgmr.msra.gmra.mxu1 %v257_v37 }
  0x4f   : > { %470 = vmatprep.mubr.f32.mxu1 %v260_v38 }
  0x50   : > { %391 = vmatmul.mubr.f32.gmra.mxu0 %v227_v39 }
  0x51   : > { %395 = vmatprep.mubr.f32.mxu0 %v230_v40 }
  0x52   : > { %471 = vmatmul.mubr.f32.gmra.mxu1 %v259_v41 }
  0x53   : > { %475 = vmatprep.mubr.f32.mxu1 %v262_v42 }
  0x54   : > { %396 = vmatmul.mubr.f32.gmra.mxu0 %v229_v43 }
  0x55   : > { %400 = vmatprep.mubr.f32.mxu0 %v232_v44 }
  0x56   : > { %476 = vmatmul.mubr.f32.gmra.mxu1 %v261_v45 }
  0x57   : > { %480 = vmatprep.mubr.f32.mxu1 %v264_v46 }
  0x58   : > { %401 = vmatmul.mubr.f32.gmra.mxu0 %v231_v47 }
  0x59   : > { %405 = vmatprep.mubr.f32.mxu0 %v234_v48 }
  0x5a   : > { %481 = vmatmul.mubr.f32.gmra.mxu1 %v263_v49 }
  0x5b   : > { %485 = vmatprep.mubr.f32.mxu1 %v266_v50 }
  0x5c   : > { %406 = vmatmul.mubr.f32.gmra.mxu0 %v233_v51 }
  0x5d   : > { %410 = vmatprep.mubr.f32.mxu0 %v236_v52 }
  0x5e   : > { %486 = vmatmul.mubr.f32.gmra.mxu1 %v265_v53 }
  0x5f   : > { %490 = vmatprep.mubr.f32.mxu1 %v268_v54 }
  0x60   : > { %411 = vmatmul.mubr.f32.gmra.mxu0 %v235_v55 }
  0x61   : > { %415 = vmatprep.mubr.f32.mxu0 %v238_v56 }
  0x62   : > { %491 = vmatmul.mubr.f32.gmra.mxu1 %v267_v57 }
  0x63   : > { %495 = vmatprep.mubr.f32.mxu1 %v270_v58 }
  0x64   : > { %416 = vmatmul.mubr.f32.gmra.mxu0 %v237_v59 }
  0x65   : > { %420 = vmatprep.mubr.f32.mxu0 %v240_v60 }
  0x66   : > { %496 = vmatmul.mubr.f32.gmra.mxu1 %v269_v61 }
  0x67   : > { %500 = vmatprep.mubr.f32.mxu1 %v272_v62 }
  0x68   : > { %421 = vmatmul.mubr.f32.gmra.mxu0 %v239_v63 }
  0x69   : > { %425 = vmatprep.mubr.f32.mxu0 %v242_v0 }
  0x6a   : > { %501 = vmatmul.mubr.f32.gmra.mxu1 %v271_v1 }
  0x6b   : > { %505 = vmatprep.mubr.f32.mxu1 %v274_v2 }
  0x6c   : > { %426 = vmatmul.mubr.f32.gmra.mxu0 %v241_v3 }
  0x6d   : > { %430 = vmatprep.mubr.f32.mxu0 %v244_v4 }
  0x6e   : > { %506 = vmatmul.mubr.f32.gmra.mxu1 %v273_v5 }
  0x6f   : > { %510 = vmatprep.mubr.f32.mxu1 %v276_v6 }
  0x70   : > { %431 = vmatmul.mubr.f32.gmra.mxu0 %v243_v7 }
  0x71   : > { %435 = vmatprep.mubr.f32.mxu0 %v246_v8 }
  0x72   : > { %511 = vmatmul.mubr.f32.gmra.mxu1 %v275_v9 }
  0x73   : > { %515 = vmatprep.mubr.f32.mxu1 %v278_v10 }
  0x74   : > { %436 = vmatmul.mubr.f32.gmra.mxu0 %v245_v11 }
  0x75   : > { %440 = vmatprep.mubr.f32.mxu0 %v248_v12 }
  0x76   : > { %516 = vmatmul.mubr.f32.gmra.mxu1 %v277_v13 }
  0x77   : > { %520 = vmatprep.mubr.f32.mxu1 %v280_v14 }
  0x78   : > { %441 = vmatmul.mubr.f32.gmra.mxu0 %v247_v15 }
  0x79   : > { %445 = vmatprep.mubr.f32.mxu0 %v250_v16 }
  0x7a   : > { %521 = vmatmul.mubr.f32.gmra.mxu1 %v279_v17 }
  0x7b   : > { %525 = vmatprep.mubr.f32.mxu1 %v282_v18 }
  0x7c   : > { %446 = vmatmul.mubr.f32.gmra.mxu0 %v249_v19 }
  0x7d   : > { %450 = vmatprep.mubr.f32.mxu0 %v252_v20 }
  0x7e   : > { %526 = vmatmul.mubr.f32.gmra.mxu1 %v281_v21 }
  0x7f   : > { %530 = vmatprep.mubr.f32.mxu1 %v284_v22 }
  0x80   : > { %451 = vmatmul.mubr.f32.gmra.mxu0 %v251_v23 }
  0x81   : > { %455 = vmatprep.mubr.f32.mxu0 %v254_v24 }
  0x82   : > { %531 = vmatmul.mubr.f32.gmra.mxu1 %v283_v25 }
  0x83   : > { %535 = vmatprep.mubr.f32.mxu1 %v286_v26 }
  0x84   : > { %456 = vmatmul.mubr.f32.gmra.mxu0 %v253_v27 }
  0x85   : > { %460 = vmatprep.mubr.f32.mxu0 %v256_v28 }
  0x86   : > { %536 = vmatmul.mubr.f32.gmra.mxu1 %v285_v29 }
  0x87   : > { %540 = vmatprep.mubr.f32.mxu1 %v288_v30 }
  0x88   : > { %461 = vmatmul.mubr.f32.gmra.mxu0 %v255_v31 }
  0x8a   : > { %541 = vmatmul.mubr.f32.gmra.mxu1 %v287_v32 }
 0x10c   : > { %v387_v33 = vpop.f32.mrf.mxu0 }
 0x10d   : > { %546 = vst [vmem:[%s1173_s20] sm:$0xff] %v387_v33  ;;  %v615_v3 = vmul.f32 %v387_v33, %v387_v33 }
 0x10e   : > { %v389_v34 = vpop.f32.mrf.mxu0  ;;  %v1176_v35 = vpop.f32.mrf.mxu1 }
 0x10f   : > { %562 = vst [vmem:[%s1173_s20 + $0x80] sm:$0xff] %v1176_v35 }
 0x110   : > { %v392_v36 = vpop.f32.mrf.mxu0  ;;  %v469_v37 = vpop.f32.mrf.mxu1 }
 0x111   : > { %547 = vst [vmem:[%s1173_s20 + $0x8] sm:$0xff] %v392_v36  ;;  %v616_v0 = vmul.f32 %v392_v36, %v392_v36  ;;  %v578_v4 = vadd.f32 %v392_v36, %v387_v33 }
 0x112   : > { %v394_v38 = vpop.f32.mrf.mxu0  ;;  %v1181_v39 = vpop.f32.mrf.mxu1 }
 0x113   : > { %563 = vst [vmem:[%s1173_s20 + $0x88] sm:$0xff] %v1181_v39  ;;  %v647_v8 = vadd.f32 %v616_v0, %v615_v3 }
 0x114   : > { %v397_v40 = vpop.f32.mrf.mxu0  ;;  %v474_v41 = vpop.f32.mrf.mxu1 }
 0x115   : > { %548 = vst [vmem:[%s1173_s20 + $0x10] sm:$0xff] %v397_v40  ;;  %v617_v5 = vmul.f32 %v397_v40, %v397_v40  ;;  %v579_v9 = vadd.f32 %v578_v4, %v397_v40 }
 0x116   : > { %v399_v42 = vpop.f32.mrf.mxu0  ;;  %v1186_v43 = vpop.f32.mrf.mxu1 }
 0x117   : > { %564 = vst [vmem:[%s1173_s20 + $0x90] sm:$0xff] %v1186_v43  ;;  %v648_v13 = vadd.f32 %v647_v8, %v617_v5 }
 0x118   : > { %v402_v44 = vpop.f32.mrf.mxu0  ;;  %v479_v45 = vpop.f32.mrf.mxu1 }
 0x119   : > { %549 = vst [vmem:[%s1173_s20 + $0x18] sm:$0xff] %v402_v44  ;;  %v618_v10 = vmul.f32 %v402_v44, %v402_v44  ;;  %v580_v14 = vadd.f32 %v579_v9, %v402_v44 }
 0x11a   : > { %v404_v46 = vpop.f32.mrf.mxu0  ;;  %v1191_v47 = vpop.f32.mrf.mxu1 }
 0x11b   : > { %565 = vst [vmem:[%s1173_s20 + $0x98] sm:$0xff] %v1191_v47  ;;  %v649_v18 = vadd.f32 %v648_v13, %v618_v10 }
 0x11c   : > { %v407_v48 = vpop.f32.mrf.mxu0  ;;  %v484_v49 = vpop.f32.mrf.mxu1 }
 0x11d   : > { %550 = vst [vmem:[%s1173_s20 + $0x20] sm:$0xff] %v407_v48  ;;  %v619_v15 = vmul.f32 %v407_v48, %v407_v48  ;;  %v581_v19 = vadd.f32 %v580_v14, %v407_v48 }
 0x11e   : > { %v409_v50 = vpop.f32.mrf.mxu0  ;;  %v1196_v51 = vpop.f32.mrf.mxu1 }
 0x11f   : > { %566 = vst [vmem:[%s1173_s20 + $0xa0] sm:$0xff] %v1196_v51  ;;  %v650_v23 = vadd.f32 %v649_v18, %v619_v15 }
 0x120   : > { %v412_v52 = vpop.f32.mrf.mxu0  ;;  %v489_v53 = vpop.f32.mrf.mxu1 }
 0x121   : > { %551 = vst [vmem:[%s1173_s20 + $0x28] sm:$0xff] %v412_v52  ;;  %v620_v20 = vmul.f32 %v412_v52, %v412_v52  ;;  %v582_v24 = vadd.f32 %v581_v19, %v412_v52 }
 0x122   : > { %v414_v54 = vpop.f32.mrf.mxu0  ;;  %v1201_v55 = vpop.f32.mrf.mxu1 }
 0x123   : > { %567 = vst [vmem:[%s1173_s20 + $0xa8] sm:$0xff] %v1201_v55  ;;  %v651_v28 = vadd.f32 %v650_v23, %v620_v20  ;;  %v631_v23 = vmul.f32 %v1176_v35, %v1176_v35 }
 0x124   : > { %v417_v56 = vpop.f32.mrf.mxu0  ;;  %v494_v57 = vpop.f32.mrf.mxu1 }
 0x125   : > { %552 = vst [vmem:[%s1173_s20 + $0x30] sm:$0xff] %v417_v56  ;;  %v621_v25 = vmul.f32 %v417_v56, %v417_v56  ;;  %v583_v29 = vadd.f32 %v582_v24, %v417_v56 }
 0x126   : > { %v419_v58 = vpop.f32.mrf.mxu0  ;;  %v1206_v59 = vpop.f32.mrf.mxu1 }
 0x127   : > { %568 = vst [vmem:[%s1173_s20 + $0xb0] sm:$0xff] %v1206_v59  ;;  %v652_v33 = vadd.f32 %v651_v28, %v621_v25  ;;  %v632_v28 = vmul.f32 %v1181_v39, %v1181_v39 }
 0x128   : > { %v422_v60 = vpop.f32.mrf.mxu0  ;;  %v499_v61 = vpop.f32.mrf.mxu1 }
 0x129   : > { %553 = vst [vmem:[%s1173_s20 + $0x38] sm:$0xff] %v422_v60  ;;  %v622_v30 = vmul.f32 %v422_v60, %v422_v60  ;;  %v584_v34 = vadd.f32 %v583_v29, %v422_v60 }
 0x12a   : > { %v424_v62 = vpop.f32.mrf.mxu0  ;;  %v1211_v63 = vpop.f32.mrf.mxu1 }
 0x12b   : > { %569 = vst [vmem:[%s1173_s20 + $0xb8] sm:$0xff] %v1211_v63  ;;  %v653_v40 = vadd.f32 %v652_v33, %v622_v30 }
 0x12c   : > { %v427_v1 = vpop.f32.mrf.mxu0  ;;  %v504_v2 = vpop.f32.mrf.mxu1 }
 0x12d   : > { %554 = vst [vmem:[%s1173_s20 + $0x40] sm:$0xff] %v427_v1  ;;  %v623_v36 = vmul.f32 %v427_v1, %v427_v1  ;;  %v585_v41 = vadd.f32 %v584_v34, %v427_v1  ;;  %v634_v34 = vmul.f32 %v1191_v47, %v1191_v47 }
 0x12e   : > { %v429_v6 = vpop.f32.mrf.mxu0  ;;  %v1216_v7 = vpop.f32.mrf.mxu1 }
 0x12f   : > { %570 = vst [vmem:[%s1173_s20 + $0xc0] sm:$0xff] %v1216_v7  ;;  %v654_v46 = vadd.f32 %v653_v40, %v623_v36 }
 0x130   : > { %v432_v11 = vpop.f32.mrf.mxu0  ;;  %v509_v12 = vpop.f32.mrf.mxu1 }
 0x131   : > { %555 = vst [vmem:[%s1173_s20 + $0x48] sm:$0xff] %v432_v11  ;;  %v624_v42 = vmul.f32 %v432_v11, %v432_v11  ;;  %v586_v48 = vadd.f32 %v585_v41, %v432_v11 }
 0x132   : > { %v434_v16 = vpop.f32.mrf.mxu0  ;;  %v1221_v17 = vpop.f32.mrf.mxu1 }
 0x133   : > { %571 = vst [vmem:[%s1173_s20 + $0xc8] sm:$0xff] %v1221_v17  ;;  %v655_v53 = vadd.f32 %v654_v46, %v624_v42 }
 0x134   : > { %v437_v21 = vpop.f32.mrf.mxu0  ;;  %v514_v22 = vpop.f32.mrf.mxu1 }
 0x135   : > { %556 = vst [vmem:[%s1173_s20 + $0x50] sm:$0xff] %v437_v21  ;;  %v625_v49 = vmul.f32 %v437_v21, %v437_v21  ;;  %v587_v54 = vadd.f32 %v586_v48, %v437_v21 }
 0x136   : > { %v439_v26 = vpop.f32.mrf.mxu0  ;;  %v1226_v27 = vpop.f32.mrf.mxu1 }
 0x137   : > { %572 = vst [vmem:[%s1173_s20 + $0xd0] sm:$0xff] %v1226_v27  ;;  %v656_v60 = vadd.f32 %v655_v53, %v625_v49 }
 0x138   : > { %v442_v31 = vpop.f32.mrf.mxu0  ;;  %v519_v32 = vpop.f32.mrf.mxu1 }
 0x139   : > { %557 = vst [vmem:[%s1173_s20 + $0x58] sm:$0xff] %v442_v31  ;;  %v626_v56 = vmul.f32 %v442_v31, %v442_v31  ;;  %v588_v61 = vadd.f32 %v587_v54, %v442_v31  ;;  %v633_v31 = vmul.f32 %v1186_v43, %v1186_v43 }
 0x13a   : > { %v444_v37 = vpop.f32.mrf.mxu0  ;;  %v1231_v38 = vpop.f32.mrf.mxu1 }
 0x13b   : > { %573 = vst [vmem:[%s1173_s20 + $0xd8] sm:$0xff] %v1231_v38  ;;  %v657_v2 = vadd.f32 %v656_v60, %v626_v56  ;;  %v635_v37 = vmul.f32 %v1196_v51, %v1196_v51  ;;  %v640_v56 = vmul.f32 %v1221_v17, %v1221_v17 }
 0x13c   : > { %v447_v44 = vpop.f32.mrf.mxu0  ;;  %v524_v45 = vpop.f32.mrf.mxu1 }
 0x13d   : > { %558 = vst [vmem:[%s1173_s20 + $0x60] sm:$0xff] %v447_v44  ;;  %v627_v62 = vmul.f32 %v447_v44, %v447_v44  ;;  %v589_v3 = vadd.f32 %v588_v61, %v447_v44 }
 0x13e   : > { %v449_v50 = vpop.f32.mrf.mxu0  ;;  %v1236_v52 = vpop.f32.mrf.mxu1 }
 0x13f   : > { %574 = vst [vmem:[%s1173_s20 + $0xe0] sm:$0xff] %v1236_v52  ;;  %v658_v8 = vadd.f32 %v657_v2, %v627_v62  ;;  %v639_v50 = vmul.f32 %v1216_v7, %v1216_v7 }
 0x140   : > { %v452_v57 = vpop.f32.mrf.mxu0  ;;  %v529_v58 = vpop.f32.mrf.mxu1 }
 0x141   : > { %559 = vst [vmem:[%s1173_s20 + $0x68] sm:$0xff] %v452_v57  ;;  %v628_v4 = vmul.f32 %v452_v57, %v452_v57  ;;  %v590_v9 = vadd.f32 %v589_v3, %v452_v57 }
 0x142   : > { %v454_v0 = vpop.f32.mrf.mxu0  ;;  %v1241_v1 = vpop.f32.mrf.mxu1 }
 0x143   : > { %575 = vst [vmem:[%s1173_s20 + $0xe8] sm:$0xff] %v1241_v1  ;;  %v659_v13 = vadd.f32 %v658_v8, %v628_v4  ;;  %v644_v3 = vmul.f32 %v1241_v1, %v1241_v1 }
 0x144   : > { %v457_v5 = vpop.f32.mrf.mxu0  ;;  %v534_v6 = vpop.f32.mrf.mxu1 }
 0x145   : > { %560 = vst [vmem:[%s1173_s20 + $0x70] sm:$0xff] %v457_v5  ;;  %v629_v10 = vmul.f32 %v457_v5, %v457_v5  ;;  %v591_v14 = vadd.f32 %v590_v9, %v457_v5 }
 0x146   : > { %v459_v11 = vpop.f32.mrf.mxu0  ;;  %v537_v12 = vpop.f32.mrf.mxu1 }
 0x147   : > { %576 = vst [vmem:[%s1173_s20 + $0xf0] sm:$0xff] %v537_v12  ;;  %v660_v18 = vadd.f32 %v659_v13, %v629_v10  ;;  %v645_v5 = vmul.f32 %v537_v12, %v537_v12 }
 0x148   : > { %v462_v15 = vpop.f32.mrf.mxu0  ;;  %v539_v16 = vpop.f32.mrf.mxu1 }
 0x149   : > { %561 = vst [vmem:[%s1173_s20 + $0x78] sm:$0xff] %v462_v15  ;;  %v592_v19 = vadd.f32 %v591_v14, %v462_v15  ;;  %v630_v20 = vmul.f32 %v462_v15, %v462_v15 }
 0x14a   : > { %v464_v21 = vpop.f32.mrf.mxu0  ;;  %v542_v22 = vpop.f32.mrf.mxu1 }
 0x14b   : > { %v593_v24 = vadd.f32 %v592_v19, %v1176_v35  ;;  %v661_v25 = vadd.f32 %v660_v18, %v630_v20  ;;  %577 = vst [vmem:[%s1173_s20 + $0xf8] sm:$0xff] %v542_v22  ;;  %v646_v6 = vmul.f32 %v542_v22, %v542_v22 }
 0x14c   : > { %v544_v26 = vpop.f32.mrf.mxu1 }
 0x14d   : > { %v594_v29 = vadd.f32 %v593_v24, %v1181_v39  ;;  %v662_v30 = vadd.f32 %v661_v25, %v631_v23  ;;  %v636_v39 = vmul.f32 %v1201_v55, %v1201_v55 }
 0x14f   : > { %v595_v32 = vadd.f32 %v594_v29, %v1186_v43  ;;  %v663_v33 = vadd.f32 %v662_v30, %v632_v28  ;;  %v637_v43 = vmul.f32 %v1206_v59, %v1206_v59 }
 0x151   : > { %v596_v35 = vadd.f32 %v595_v32, %v1191_v47  ;;  %v664_v36 = vadd.f32 %v663_v33, %v633_v31  ;;  %v638_v47 = vmul.f32 %v1211_v63, %v1211_v63 }
 0x153   : > { %v665_v40 = vadd.f32 %v664_v36, %v634_v34  ;;  %v597_v41 = vadd.f32 %v596_v35, %v1196_v51 }
 0x155   : > { %v598_v42 = vadd.f32 %v597_v41, %v1201_v55  ;;  %v666_v44 = vadd.f32 %v665_v40, %v635_v37 }
 0x157   : > { %v599_v45 = vadd.f32 %v598_v42, %v1206_v59  ;;  %v667_v46 = vadd.f32 %v666_v44, %v636_v39 }
 0x159   : > { %v600_v48 = vadd.f32 %v599_v45, %v1211_v63  ;;  %v668_v49 = vadd.f32 %v667_v46, %v637_v43  ;;  %v641_v63 = vmul.f32 %v1226_v27, %v1226_v27 }
 0x15b   : > { %v601_v51 = vadd.f32 %v600_v48, %v1216_v7  ;;  %v669_v53 = vadd.f32 %v668_v49, %v638_v47  ;;  %v642_v7 = vmul.f32 %v1231_v38, %v1231_v38 }
 0x15d   : > { %v670_v55 = vadd.f32 %v669_v53, %v639_v50  ;;  %v602_v54 = vadd.f32 %v601_v51, %v1221_v17  ;;  %v643_v17 = vmul.f32 %v1236_v52, %v1236_v52 }
 0x15f   : > { %v671_v59 = vadd.f32 %v670_v55, %v640_v56  ;;  %v603_v57 = vadd.f32 %v602_v54, %v1226_v27 }
 0x161   : > { %v672_v58 = vadd.f32 %v671_v59, %v641_v63  ;;  %v604_v60 = vadd.f32 %v603_v57, %v1231_v38 }
 0x163   : > { %v673_v61 = vadd.f32 %v672_v58, %v642_v7  ;;  %v605_v62 = vadd.f32 %v604_v60, %v1236_v52 }
 0x165   : > { %v674_v0 = vadd.f32 %v673_v61, %v643_v17  ;;  %v606_v2 = vadd.f32 %v605_v62, %v1241_v1 }
 0x167   : > { %v675_v27 = vadd.f32 %v674_v0, %v644_v3  ;;  %v607_v4 = vadd.f32 %v606_v2, %v537_v12 }
 0x169   : > { %v676_v8 = vadd.f32 %v675_v27, %v645_v5  ;;  %v608_v38 = vadd.f32 %v607_v4, %v542_v22 }
 0x16b   : > { %v609_v9 = vrot.slane %v608_v38, 4  ;;  %v677_v10 = vadd.f32 %v676_v8, %v646_v6 }
 0x16d   : > { %v610_v11 = vadd.f32 %v609_v9, %v608_v38  ;;  %v678_v13 = vrot.slane %v677_v10, 4 }
 0x16f   : > { %v611_v14 = vrot.slane %v610_v11, 2  ;;  %v679_v52 = vadd.f32 %v678_v13, %v677_v10 }
 0x171   : > { %v612_v15 = vadd.f32 %v611_v14, %v610_v11  ;;  %v680_v16 = vrot.slane %v679_v52, 2 }
 0x173   : > { %v613_v18 = vrot.slane %v612_v15, 1  ;;  %v681_v19 = vadd.f32 %v680_v16, %v679_v52 }
 0x175   : > { %v614_v1 = vadd.f32 %v613_v18, %v612_v15  ;;  %v682_v12 = vrot.slane %v681_v19, 1 }
 0x177   : > { %v683_v20 = vadd.f32 %v682_v12, %v681_v19  ;;  %684 = vst [vmem:[%s220_s22] sm:$0xff] %v614_v1 }
 0x179   : > { %685 = vst [vmem:[%s224_s25] sm:$0xff] %v683_v20 }
 0x17a PF: > { %s15_s15 = sadd.s32 1, %s898_s15  }
 0x17b   : > { %p12_p5 = scmp.ge.s32.totalorder %s15_s15, 4  }
 0x17d   :  { %14 = sbr.rel (!%p12_p5) target bundleno = 1 (0x1), region = 82 }

// kernel: _forward.3
= control target key start
LH: loop header
LB: loop body
LE: loop exit
PB: predicated region body
PF: predicated region fallthrough
CT: control target
= control target key end

     0   :  { %s453_s12 = smov 0   ;;  %s612_s0 = inlined_call_operand.vmem [shape: f32[512,128], index: 0, kind: input, shape index: {}]   ;;  %s613_s1 = inlined_call_operand.vmem [shape: f32[1,128], index: 1, kind: input, shape index: {}]   ;;  %s614_s2 = inlined_call_operand.vmem [shape: f32[1,128], index: 2, kind: input, shape index: {}]   ;;  %s615_s3 = inlined_call_operand.vmem [shape: f32[512,128], index: 3, kind: output, shape index: {}]  }
   0x1 LB: > { %s404_s13 = sadd.s32 4294967295, %s431_s12   ;;  %p408_p0 = scmp.ge.s32.totalorder %s431_s12, 1  ;;  %s431_s12 = sphi %s453_s12, %s13_s12  }
   0x2   : > { %p138_p1 = scmp.lt.s32.totalorder %s431_s12, 3 }
   0x4   : > { %p139_p2 = pnand %p408_p0, %p138_p1 }
   0x5   : > { %s409_s14 = sshll.u32 (!%p139_p2), %s404_s13, 5 }
   0x6   : > { %142 = sbr.rel (%p139_p2) target bundleno = 44 (0x2c), region = 32  ;;  %p163_p3 = scmp.lt.s32.totalorder (!%p139_p2), %s409_s14, 63 }
   0xb   : > { %s617_s14 = smov (!%p163_p3, %s409_s14), 63  ;;  %v464_v0 = vld [vmem:[%s613_s1] ss:$0 sm:$0xff] }
   0xc   : > { %s410_s15 = sshll.u32 %s617_s14, 3  ;;  %v474_v1 = vld [vmem:[%s614_s2] ss:$0 sm:$0xff] }
   0xd   : > { %s469_s20 = scalar_lea.vmem %s612_s0, %s410_s15  ;;  %s497_s25 = scalar_lea.vmem %s615_s3, %s410_s15 }
   0xe   : > { %v174_v2 = vld [vmem:[%s469_s20] sm:$0xff]  ;;  %v175_v3 = vld [vmem:[%s469_s20 + $0x8] sm:$0xff]  ;;  %v176_v4 = vld [vmem:[%s469_s20 + $0x10] sm:$0xff] }
   0xf   : > { %v213_v5 = vmul.f32 %v464_v0, %v174_v2  ;;  %v214_v6 = vmul.f32 %v464_v0, %v175_v3  ;;  %v215_v7 = vmul.f32 %v464_v0, %v176_v4  ;;  %v177_v8 = vld [vmem:[%s469_s20 + $0x18] sm:$0xff]  ;;  %v178_v9 = vld [vmem:[%s469_s20 + $0x20] sm:$0xff]  ;;  %v179_v10 = vld [vmem:[%s469_s20 + $0x28] sm:$0xff] }
  0x10   : > { %v216_v11 = vmul.f32 %v464_v0, %v177_v8  ;;  %v217_v12 = vmul.f32 %v464_v0, %v178_v9  ;;  %v218_v13 = vmul.f32 %v464_v0, %v179_v10  ;;  %v180_v14 = vld [vmem:[%s469_s20 + $0x30] sm:$0xff]  ;;  %v181_v15 = vld [vmem:[%s469_s20 + $0x38] sm:$0xff]  ;;  %v182_v24 = vld [vmem:[%s469_s20 + $0x40] sm:$0xff] }
  0x11   : > { %v252_v16 = vadd.f32 %v474_v1, %v213_v5  ;;  %v253_v17 = vadd.f32 %v474_v1, %v214_v6  ;;  %v254_v18 = vadd.f32 %v474_v1, %v215_v7  ;;  %v219_v19 = vmul.f32 %v464_v0, %v180_v14  ;;  %v183_v25 = vld [vmem:[%s469_s20 + $0x48] sm:$0xff]  ;;  %v184_v26 = vld [vmem:[%s469_s20 + $0x50] sm:$0xff]  ;;  %v185_v31 = vld [vmem:[%s469_s20 + $0x58] sm:$0xff] }
  0x12   : > { %v255_v20 = vadd.f32 %v474_v1, %v216_v11  ;;  %v256_v21 = vadd.f32 %v474_v1, %v217_v12  ;;  %v257_v22 = vadd.f32 %v474_v1, %v218_v13  ;;  %v220_v23 = vmul.f32 %v464_v0, %v181_v15  ;;  %v186_v32 = vld [vmem:[%s469_s20 + $0x60] sm:$0xff]  ;;  %v187_v33 = vld [vmem:[%s469_s20 + $0x68] sm:$0xff]  ;;  %v188_v38 = vld [vmem:[%s469_s20 + $0x70] sm:$0xff] }
  0x13   : > { %v284_v27 = vmax.f32 %v252_v16, 0.0  ;;  %v285_v28 = vmax.f32 %v253_v17, 0.0  ;;  %v286_v29 = vmax.f32 %v254_v18, 0.0  ;;  %v258_v30 = vadd.f32 %v474_v1, %v219_v19  ;;  %v189_v43 = vld [vmem:[%s469_s20 + $0x78] sm:$0xff]  ;;  %v190_v56 = vld [vmem:[%s469_s20 + $0x80] sm:$0xff]  ;;  %v191_v57 = vld [vmem:[%s469_s20 + $0x88] sm:$0xff] }
  0x14   : > { %v287_v34 = vmax.f32 %v255_v20, 0.0  ;;  %v288_v35 = vmax.f32 %v256_v21, 0.0  ;;  %v289_v36 = vmax.f32 %v257_v22, 0.0  ;;  %v259_v37 = vadd.f32 %v474_v1, %v220_v23  ;;  %v192_v58 = vld [vmem:[%s469_s20 + $0x90] sm:$0xff]  ;;  %v193_v63 = vld [vmem:[%s469_s20 + $0x98] sm:$0xff]  ;;  %v194_v2 = vld [vmem:[%s469_s20 + $0xa0] sm:$0xff] }
  0x15   : > { %316 = vst [vmem:[%s497_s25] sm:$0xff] %v284_v27  ;;  %317 = vst [vmem:[%s497_s25 + $0x8] sm:$0xff] %v285_v28  ;;  %v290_v39 = vmax.f32 %v258_v30, 0.0  ;;  %v221_v40 = vmul.f32 %v464_v0, %v182_v24  ;;  %v222_v41 = vmul.f32 %v464_v0, %v183_v25  ;;  %v223_v42 = vmul.f32 %v464_v0, %v184_v26  ;;  %v195_v3 = vld [vmem:[%s469_s20 + $0xa8] sm:$0xff]  ;;  %v196_v8 = vld [vmem:[%s469_s20 + $0xb0] sm:$0xff] }
  0x16   : > { %318 = vst [vmem:[%s497_s25 + $0x10] sm:$0xff] %v286_v29  ;;  %319 = vst [vmem:[%s497_s25 + $0x18] sm:$0xff] %v287_v34  ;;  %v291_v44 = vmax.f32 %v259_v37, 0.0  ;;  %v224_v45 = vmul.f32 %v464_v0, %v185_v31  ;;  %v225_v46 = vmul.f32 %v464_v0, %v186_v32  ;;  %v226_v47 = vmul.f32 %v464_v0, %v187_v33  ;;  %v197_v13 = vld [vmem:[%s469_s20 + $0xb8] sm:$0xff]  ;;  %v198_v26 = vld [vmem:[%s469_s20 + $0xc0] sm:$0xff] }
  0x17   : > { %320 = vst [vmem:[%s497_s25 + $0x20] sm:$0xff] %v288_v35  ;;  %321 = vst [vmem:[%s497_s25 + $0x28] sm:$0xff] %v289_v36  ;;  %v260_v48 = vadd.f32 %v474_v1, %v221_v40  ;;  %v261_v49 = vadd.f32 %v474_v1, %v222_v41  ;;  %v262_v50 = vadd.f32 %v474_v1, %v223_v42  ;;  %v199_v27 = vld [vmem:[%s469_s20 + $0xc8] sm:$0xff]  ;;  %v200_v28 = vld [vmem:[%s469_s20 + $0xd0] sm:$0xff] }
  0x18   : > { %322 = vst [vmem:[%s497_s25 + $0x30] sm:$0xff] %v290_v39  ;;  %v227_v51 = vmul.f32 %v464_v0, %v188_v38  ;;  %323 = vst [vmem:[%s497_s25 + $0x38] sm:$0xff] %v291_v44  ;;  %v263_v52 = vadd.f32 %v474_v1, %v224_v45  ;;  %v264_v53 = vadd.f32 %v474_v1, %v225_v46  ;;  %v201_v33 = vld [vmem:[%s469_s20 + $0xd8] sm:$0xff]  ;;  %v202_v34 = vld [vmem:[%s469_s20 + $0xe0] sm:$0xff] }
  0x19   : > { %v265_v54 = vadd.f32 %v474_v1, %v226_v47  ;;  %v228_v55 = vmul.f32 %v464_v0, %v189_v43  ;;  %v292_v59 = vmax.f32 %v260_v48, 0.0  ;;  %v293_v60 = vmax.f32 %v261_v49, 0.0  ;;  %v203_v35 = vld [vmem:[%s469_s20 + $0xe8] sm:$0xff]  ;;  %v204_v40 = vld [vmem:[%s469_s20 + $0xf0] sm:$0xff]  ;;  %v205_v45 = vld [vmem:[%s469_s20 + $0xf8] sm:$0xff] }
  0x1a   : > { %v294_v61 = vmax.f32 %v262_v50, 0.0  ;;  %v266_v62 = vadd.f32 %v474_v1, %v227_v51  ;;  %v295_v4 = vmax.f32 %v263_v52, 0.0  ;;  %v296_v5 = vmax.f32 %v264_v53, 0.0 }
  0x1b   : > { %v297_v6 = vmax.f32 %v265_v54, 0.0  ;;  %v267_v7 = vadd.f32 %v474_v1, %v228_v55  ;;  %324 = vst [vmem:[%s497_s25 + $0x40] sm:$0xff] %v292_v59  ;;  %325 = vst [vmem:[%s497_s25 + $0x48] sm:$0xff] %v293_v60  ;;  %v229_v10 = vmul.f32 %v464_v0, %v190_v56  ;;  %v230_v11 = vmul.f32 %v464_v0, %v191_v57 }
  0x1c   : > { %326 = vst [vmem:[%s497_s25 + $0x50] sm:$0xff] %v294_v61  ;;  %v298_v9 = vmax.f32 %v266_v62, 0.0  ;;  %v231_v12 = vmul.f32 %v464_v0, %v192_v58  ;;  %327 = vst [vmem:[%s497_s25 + $0x58] sm:$0xff] %v295_v4  ;;  %v232_v15 = vmul.f32 %v464_v0, %v193_v63  ;;  %v233_v16 = vmul.f32 %v464_v0, %v194_v2 }
  0x1d   : > { %328 = vst [vmem:[%s497_s25 + $0x60] sm:$0xff] %v296_v5  ;;  %329 = vst [vmem:[%s497_s25 + $0x68] sm:$0xff] %v297_v6  ;;  %v299_v14 = vmax.f32 %v267_v7, 0.0  ;;  %v234_v17 = vmul.f32 %v464_v0, %v195_v3  ;;  %v268_v18 = vadd.f32 %v474_v1, %v229_v10  ;;  %v269_v19 = vadd.f32 %v474_v1, %v230_v11 }
  0x1e   : > { %330 = vst [vmem:[%s497_s25 + $0x70] sm:$0xff] %v298_v9  ;;  %v270_v20 = vadd.f32 %v474_v1, %v231_v12  ;;  %v235_v21 = vmul.f32 %v464_v0, %v196_v8  ;;  %v271_v22 = vadd.f32 %v474_v1, %v232_v15  ;;  %v272_v23 = vadd.f32 %v474_v1, %v233_v16 }
  0x1f   : > { %331 = vst [vmem:[%s497_s25 + $0x78] sm:$0xff] %v299_v14  ;;  %v273_v24 = vadd.f32 %v474_v1, %v234_v17  ;;  %v236_v25 = vmul.f32 %v464_v0, %v197_v13  ;;  %v300_v29 = vmax.f32 %v268_v18, 0.0  ;;  %v301_v30 = vmax.f32 %v269_v19, 0.0 }
  0x20   : > { %v302_v31 = vmax.f32 %v270_v20, 0.0  ;;  %v274_v32 = vadd.f32 %v474_v1, %v235_v21  ;;  %v303_v36 = vmax.f32 %v271_v22, 0.0  ;;  %v304_v37 = vmax.f32 %v272_v23, 0.0 }
  0x21   : > { %v305_v38 = vmax.f32 %v273_v24, 0.0  ;;  %v275_v39 = vadd.f32 %v474_v1, %v236_v25  ;;  %332 = vst [vmem:[%s497_s25 + $0x80] sm:$0xff] %v300_v29  ;;  %333 = vst [vmem:[%s497_s25 + $0x88] sm:$0xff] %v301_v30  ;;  %v237_v42 = vmul.f32 %v464_v0, %v198_v26  ;;  %v238_v43 = vmul.f32 %v464_v0, %v199_v27 }
  0x22   : > { %334 = vst [vmem:[%s497_s25 + $0x90] sm:$0xff] %v302_v31  ;;  %v306_v41 = vmax.f32 %v274_v32, 0.0  ;;  %v239_v44 = vmul.f32 %v464_v0, %v200_v28  ;;  %335 = vst [vmem:[%s497_s25 + $0x98] sm:$0xff] %v303_v36  ;;  %v240_v47 = vmul.f32 %v464_v0, %v201_v33  ;;  %v241_v48 = vmul.f32 %v464_v0, %v202_v34 }
  0x23   : > { %336 = vst [vmem:[%s497_s25 + $0xa0] sm:$0xff] %v304_v37  ;;  %337 = vst [vmem:[%s497_s25 + $0xa8] sm:$0xff] %v305_v38  ;;  %v307_v46 = vmax.f32 %v275_v39, 0.0  ;;  %v242_v49 = vmul.f32 %v464_v0, %v203_v35  ;;  %v276_v50 = vadd.f32 %v474_v1, %v237_v42  ;;  %v277_v51 = vadd.f32 %v474_v1, %v238_v43 }
  0x24   : > { %338 = vst [vmem:[%s497_s25 + $0xb0] sm:$0xff] %v306_v41  ;;  %v278_v52 = vadd.f32 %v474_v1, %v239_v44  ;;  %v243_v53 = vmul.f32 %v464_v0, %v204_v40  ;;  %v279_v54 = vadd.f32 %v474_v1, %v240_v47  ;;  %v280_v55 = vadd.f32 %v474_v1, %v241_v48 }
  0x25   : > { %339 = vst [vmem:[%s497_s25 + $0xb8] sm:$0xff] %v307_v46  ;;  %v281_v56 = vadd.f32 %v474_v1, %v242_v49  ;;  %v244_v57 = vmul.f32 %v464_v0, %v205_v45  ;;  %v308_v58 = vmax.f32 %v276_v50, 0.0  ;;  %v309_v59 = vmax.f32 %v277_v51, 0.0 }
  0x26   : > { %v310_v60 = vmax.f32 %v278_v52, 0.0  ;;  %v282_v61 = vadd.f32 %v474_v1, %v243_v53  ;;  %v311_v62 = vmax.f32 %v279_v54, 0.0  ;;  %v312_v63 = vmax.f32 %v280_v55, 0.0 }
  0x27   : > { %v313_v2 = vmax.f32 %v281_v56, 0.0  ;;  %v283_v3 = vadd.f32 %v474_v1, %v244_v57  ;;  %340 = vst [vmem:[%s497_s25 + $0xc0] sm:$0xff] %v308_v58  ;;  %341 = vst [vmem:[%s497_s25 + $0xc8] sm:$0xff] %v309_v59 }
  0x28   : > { %342 = vst [vmem:[%s497_s25 + $0xd0] sm:$0xff] %v310_v60  ;;  %v314_v4 = vmax.f32 %v282_v61, 0.0  ;;  %343 = vst [vmem:[%s497_s25 + $0xd8] sm:$0xff] %v311_v62 }
  0x29   : > { %344 = vst [vmem:[%s497_s25 + $0xe0] sm:$0xff] %v312_v63  ;;  %345 = vst [vmem:[%s497_s25 + $0xe8] sm:$0xff] %v313_v2  ;;  %v315_v0 = vmax.f32 %v283_v3, 0.0 }
  0x2a   : > { %346 = vst [vmem:[%s497_s25 + $0xf0] sm:$0xff] %v314_v4 }
  0x2b   : > { %347 = vst [vmem:[%s497_s25 + $0xf8] sm:$0xff] %v315_v0 }
  0x2c PF: > { %s13_s12 = sadd.s32 1, %s431_s12  }
  0x2d   : > { %p10_p4 = scmp.ge.s32.totalorder %s13_s12, 4  }
  0x2f   :  { %12 = sbr.rel (!%p10_p4) target bundleno = 1 (0x1), region = 62 }

</bundles_post_ra>
